<compile_context>
chip_gen: v7x
topology: tpu7x:2x2x1
jax: 0.10.0
libtpu: 0.0.40
codegen_flags: <defaults>
</compile_context>

<pallas_src>
import functools

import jax
import jax.numpy as jnp
from jax.experimental import pallas as pl
from jax.experimental.pallas import tpu as pltpu


def _round_up(x, m):
    return ((x + m - 1) // m) * m


def _default_block_n(batch):
    # 256 fills the 256-wide MXU N dim on v6e/v7x; keep 128 on older chips
    # (128-wide MXU) and for small batches where it would only add padding.
    if batch <= 128:
        return 128
    try:
        kind = jax.devices()[0].device_kind.lower()
    except Exception:
        kind = ""
    if any(k in kind for k in ("v2", "v3", "v4", "v5 lite", "v5e", "v5litepod")):
        return 128
    return 256


def _contrastive_loss_kernel(z_row_ref, z_colT_ref, lab_row_ref, lab_col_ref,
                             out_ref, *, positive_margin, negative_margin,
                             batch, block_m, block_n, apply_pad_mask):
    j = pl.program_id(1)

    # Zero the resident per-row-block accumulator at the start of each j sweep.
    @pl.when(j == 0)
    def _():
        out_ref[...] = jnp.zeros_like(out_ref)

    # (block_m, D) @ (D, block_n) on the MXU with f32 accumulation.  Both
    # operands are pre-normalized and pre-cast in the wrapper; the RHS is
    # pre-transposed, so no XLU transpose is needed before the matmul.
    score = jax.lax.dot_general(
        z_row_ref[...], z_colT_ref[...],
        dimension_numbers=(((1,), (0,)), ((), ())),
        preferred_element_type=jnp.float32)

    # Fused hinge: one boolean select + one max.
    same = lab_row_ref[...] == lab_col_ref[...]              # (block_m, block_n)
    contrib = jnp.maximum(
        jnp.where(same, (1.0 - positive_margin) - score, score - negative_margin),
        0.0)

    # Padding mask — only compiled in when the batch actually needs padding.
    if apply_pad_mask:
        row_ids = (pl.program_id(0) * block_m
                   + jax.lax.broadcasted_iota(jnp.int32, (block_m, 1), 0))
        col_ids = (j * block_n
                   + jax.lax.broadcasted_iota(jnp.int32, (1, block_n), 1))
        contrib = jnp.where((row_ids < batch) & (col_ids < batch), contrib, 0.0)

    # Sublane tree-reduce (block_m, block_n) -> (8, block_n): log2 depth, all
    # slices sublane-aligned (multiples of 8).
    acc = contrib
    rows = block_m
    while rows > 8:
        half = rows // 2
        acc = acc[:half, :] + acc[half:, :]
        rows = half
    out_ref[...] += acc


def contrastive_loss(z, label, positive_margin=0.0, negative_margin=0.4,
                     matmul_dtype=jnp.bfloat16, block_n=None):
    """Pallas TPU implementation of ContrastiveLoss.forward.

    z:     (B, D) float array
    label: (B,)   int array
    returns: scalar float32 loss
    """
    B, D = z.shape
    z = z.astype(jnp.float32)
    label = label.astype(jnp.int32)

    # Hoisted normalization (matches F.normalize: z / max(||z||, 1e-12)), done
    # once in XLA, then cast once to the MXU streaming dtype.
    inv = jax.lax.rsqrt(jnp.maximum(jnp.sum(z * z, axis=-1, keepdims=True), 1e-24))
    z_n = (z * inv).astype(matmul_dtype)

    if block_n is None:
        block_n = _default_block_n(B)

    d_pad = _round_up(D, 128)
    b_pad = _round_up(B, block_n)
    bytes_e = jnp.dtype(matmul_dtype).itemsize

    def vmem_est(bm, bn):
        return (2 * bm * d_pad * bytes_e        # row tile, double-buffered
                + 2 * d_pad * bn * bytes_e      # col tile, double-buffered
                + 2 * 8 * bn * 4                # resident partial-sum output
                + 4 * (bm + bn) * 4)            # label tiles (generous)

    # Largest row block that divides b_pad, keeps num_i >= 2 (both v7x cores
    # busy) and stays within a conservative VMEM budget.
    block_m = 128
    for cand in (512, 256):
        if b_pad % cand == 0 and b_pad // cand >= 2 \
                and vmem_est(cand, block_n) <= (40 << 20):
            block_m = cand
            break

    num_i = b_pad // block_m
    num_j = b_pad // block_n
    vmem_limit = min(max(int(1.5 * vmem_est(block_m, block_n)) + (4 << 20),
                         32 << 20), 56 << 20)

    # Pad AFTER normalization so padded rows are exactly zero (their scores are
    # exactly 0 and the pad mask handles the hinge side).
    z_row = jnp.pad(z_n, ((0, b_pad - B), (0, d_pad - D)))
    z_colT = z_row.T                                   # (d_pad, b_pad), pre-transposed
    lab_p = jnp.pad(label, (0, b_pad - B), constant_values=-1)
    lab_row = lab_p.reshape(b_pad, 1)                  # row-block labels (col vector)
    lab_col = lab_p.reshape(1, b_pad)                  # col-block labels (row vector)

    kernel = functools.partial(
        _contrastive_loss_kernel,
        positive_margin=float(positive_margin),
        negative_margin=float(negative_margin),
        batch=B, block_m=block_m, block_n=block_n,
        apply_pad_mask=(b_pad != B))

    partials = pl.pallas_call(
        kernel,
        out_shape=jax.ShapeDtypeStruct((num_i * 8, block_n), jnp.float32),
        grid_spec=pltpu.PrefetchScalarGridSpec(
            num_scalar_prefetch=0,
            grid=(num_i, num_j),
            in_specs=[
                pl.BlockSpec((block_m, d_pad), lambda i, j: (i, 0)),  # z row tile
                pl.BlockSpec((d_pad, block_n), lambda i, j: (0, j)),  # z_n.T col tile
                pl.BlockSpec((block_m, 1), lambda i, j: (i, 0)),      # row labels
                pl.BlockSpec((1, block_n), lambda i, j: (0, j)),      # col labels
            ],
            out_specs=pl.BlockSpec((8, block_n), lambda i, j: (i, 0)),
        ),
        compiler_params=pltpu.CompilerParams(
            dimension_semantics=("parallel", "arbitrary"),
            vmem_limit_bytes=vmem_limit),
    )(z_row, z_colT, lab_row, lab_col)

    # Tiny final reduction + mean over the real B*B entries in plain JAX.
    return jnp.sum(partials) / float(B * B)


def _reference(z, label, positive_margin=0.0, negative_margin=0.4):
    # Pure-JAX reference mirroring the PyTorch forward exactly.
    z = z.astype(jnp.float32)
    z_n = z / jnp.maximum(jnp.linalg.norm(z, axis=-1, keepdims=True), 1e-12)
    score = z_n @ z_n.T
    pairwise = (label[:, None] == label[None, :]).astype(jnp.float32)
    pos = pairwise * jnp.maximum(1.0 - score - positive_margin, 0.0)
    neg = (1.0 - pairwise) * jnp.maximum(score - negative_margin, 0.0)
    return jnp.mean(pos + neg)


if __name__ == "__main__":
    key = jax.random.PRNGKey(0)
    kz, kl = jax.random.split(key)
    B, D = 8, 32
    z = jax.random.normal(kz, (B, D), dtype=jnp.float32)
    label = jax.random.randint(kl, (B,), minval=0, maxval=3, dtype=jnp.int32)

    ref = _reference(z, label)

    # f32 MXU path: faithful to the reference.
    loss_f32 = jax.block_until_ready(
        contrastive_loss(z, label, matmul_dtype=jnp.float32))
    assert jnp.allclose(loss_f32, ref, atol=2e-3, rtol=2e-3), (loss_f32, ref)

    # bf16 streaming path (default; the fast path on v6e/v7x): looser tolerance
    # (normalized scores can drift ~1e-2 and hinge terms near the margin flip).
    loss_bf16 = jax.block_until_ready(contrastive_loss(z, label))
    assert jnp.allclose(loss_bf16, ref, atol=2e-2, rtol=2e-2), (loss_bf16, ref)

    print("KERNEL_OK")
</pallas_src>

<mosaic_0001>
module attributes {stable_mosaic.version = 11 : i64} {
  func.func @_contrastive_loss_kernel(%arg0: i32, %arg1: i32, %arg2: memref<128x128xf32, #tpu.memory_space<vmem>>, %arg3: memref<128x128xf32, #tpu.memory_space<vmem>>, %arg4: memref<128x1xi32, #tpu.memory_space<vmem>>, %arg5: memref<1x128xi32, #tpu.memory_space<vmem>>, %arg6: memref<8x128xf32, #tpu.memory_space<vmem>>) attributes {dimension_semantics = [#tpu.dimension_semantics<parallel>, #tpu.dimension_semantics<arbitrary>], iteration_bounds = array<i64: 1, 1>, scalar_prefetch = 0 : i64, scratch_operands = 0 : i64, tpu.core_type = #tpu.core_type<tc>, window_params = [{transform_indices = @transform_0, window_bounds = array<i64: 128, 128>}, {transform_indices = @transform_1, window_bounds = array<i64: 128, 128>}, {transform_indices = @transform_2, window_bounds = array<i64: 128, 1>}, {transform_indices = @transform_3, window_bounds = array<i64: 1, 128>}, {transform_indices = @transform_4, window_bounds = array<i64: 8, 128>}]} {
    %c0_i32 = arith.constant 0 : i32
    %0 = arith.cmpi eq, %arg1, %c0_i32 : i32
    %1 = arith.extui %0 : i1 to i32
    %c0_i32_0 = arith.constant 0 : i32
    %2 = arith.cmpi ne, %1, %c0_i32_0 : i32
    scf.if %2 {
      %cst_18 = arith.constant 0.000000e+00 : f32
      %50 = vector.broadcast %cst_18 : f32 to vector<8x128xf32>
      %c0_19 = arith.constant 0 : index
      %c0_20 = arith.constant 0 : index
      %51 = vector.load %arg6[%c0_19, %c0_20] : memref<8x128xf32, #tpu.memory_space<vmem>>, vector<8x128xf32>
      tpu.vector_store %arg6[%c0_19, %c0_20], %50 {strides = array<i32>} : memref<8x128xf32, #tpu.memory_space<vmem>>, vector<8x128xf32>,
    } else {
    }
    %c0 = arith.constant 0 : index
    %c0_1 = arith.constant 0 : index
    %3 = vector.load %arg2[%c0, %c0_1] : memref<128x128xf32, #tpu.memory_space<vmem>>, vector<128x128xf32>
    %c0_2 = arith.constant 0 : index
    %c0_3 = arith.constant 0 : index
    %4 = vector.load %arg3[%c0_2, %c0_3] : memref<128x128xf32, #tpu.memory_space<vmem>>, vector<128x128xf32>
    %cst = arith.constant dense<0.000000e+00> : vector<128x128xf32>
    %5 = tpu.matmul %3, %4, %cst {dimension_numbers = #tpu.dot_dimension_numbers<[1], [0], [0], [1], [0, 0, 1, 1], [], []>} : vector<128x128xf32>, vector<128x128xf32>, vector<128x128xf32> -> vector<128x128xf32>
    %c0_4 = arith.constant 0 : index
    %c0_5 = arith.constant 0 : index
    %6 = vector.load %arg4[%c0_4, %c0_5] : memref<128x1xi32, #tpu.memory_space<vmem>>, vector<128x1xi32>
    %c0_6 = arith.constant 0 : index
    %c0_7 = arith.constant 0 : index
    %7 = vector.load %arg5[%c0_6, %c0_7] : memref<1x128xi32, #tpu.memory_space<vmem>>, vector<1x128xi32>
    %8 = vector.broadcast %6 : vector<128x1xi32> to vector<128x128xi32>
    %9 = vector.broadcast %7 : vector<1x128xi32> to vector<128x128xi32>
    %10 = arith.cmpi eq, %8, %9 : vector<128x128xi32>
    %cst_8 = arith.constant 1.000000e+00 : f32
    %11 = vector.broadcast %cst_8 : f32 to vector<128x128xf32>
    %12 = arith.subf %11, %5 : vector<128x128xf32>
    %cst_9 = arith.constant 4.000000e-01 : f32
    %13 = vector.broadcast %cst_9 : f32 to vector<128x128xf32>
    %14 = arith.subf %5, %13 : vector<128x128xf32>
    %15 = arith.select %10, %12, %14 : vector<128x128xi1>, vector<128x128xf32>
    %cst_10 = arith.constant 0.000000e+00 : f32
    %16 = vector.broadcast %cst_10 : f32 to vector<128x128xf32>
    %17 = arith.maximumf %15, %16 : vector<128x128xf32>
    %c128_i32 = arith.constant 128 : i32
    %18 = arith.muli %arg0, %c128_i32 : i32
    %19 = tpu.iota {dimensions = array<i32: 0>} : vector<128x1xi32>
    %20 = vector.broadcast %18 : i32 to vector<128x1xi32>
    %21 = arith.addi %20, %19 : vector<128x1xi32>
    %c128_i32_11 = arith.constant 128 : i32
    %22 = arith.muli %arg1, %c128_i32_11 : i32
    %23 = tpu.iota {dimensions = array<i32: 1>} : vector<1x128xi32>
    %24 = vector.broadcast %22 : i32 to vector<1x128xi32>
    %25 = arith.addi %24, %23 : vector<1x128xi32>
    %c8_i32 = arith.constant 8 : i32
    %26 = vector.broadcast %c8_i32 : i32 to vector<128x1xi32>
    %27 = arith.cmpi slt, %21, %26 : vector<128x1xi32>
    %c8_i32_12 = arith.constant 8 : i32
    %28 = vector.broadcast %c8_i32_12 : i32 to vector<1x128xi32>
    %29 = arith.cmpi slt, %25, %28 : vector<1x128xi32>
    %30 = vector.broadcast %27 : vector<128x1xi1> to vector<128x128xi1>
    %31 = vector.broadcast %29 : vector<1x128xi1> to vector<128x128xi1>
    %32 = arith.andi %30, %31 : vector<128x128xi1>
    %cst_13 = arith.constant 0.000000e+00 : f32
    %33 = vector.broadcast %cst_13 : f32 to vector<128x128xf32>
    %34 = arith.select %32, %17, %33 : vector<128x128xi1>, vector<128x128xf32>
    %35 = vector.extract_strided_slice %34 {offsets = [0, 0], sizes = [64, 128], strides = [1, 1]} : vector<128x128xf32> to vector<64x128xf32>
    %36 = vector.extract_strided_slice %34 {offsets = [64, 0], sizes = [64, 128], strides = [1, 1]} : vector<128x128xf32> to vector<64x128xf32>
    %37 = arith.addf %35, %36 : vector<64x128xf32>
    %38 = vector.extract_strided_slice %37 {offsets = [0, 0], sizes = [32, 128], strides = [1, 1]} : vector<64x128xf32> to vector<32x128xf32>
    %39 = vector.extract_strided_slice %37 {offsets = [32, 0], sizes = [32, 128], strides = [1, 1]} : vector<64x128xf32> to vector<32x128xf32>
    %40 = arith.addf %38, %39 : vector<32x128xf32>
    %41 = vector.extract_strided_slice %40 {offsets = [0, 0], sizes = [16, 128], strides = [1, 1]} : vector<32x128xf32> to vector<16x128xf32>
    %42 = vector.extract_strided_slice %40 {offsets = [16, 0], sizes = [16, 128], strides = [1, 1]} : vector<32x128xf32> to vector<16x128xf32>
    %43 = arith.addf %41, %42 : vector<16x128xf32>
    %44 = vector.extract_strided_slice %43 {offsets = [0, 0], sizes = [8, 128], strides = [1, 1]} : vector<16x128xf32> to vector<8x128xf32>
    %45 = vector.extract_strided_slice %43 {offsets = [8, 0], sizes = [8, 128], strides = [1, 1]} : vector<16x128xf32> to vector<8x128xf32>
    %46 = arith.addf %44, %45 : vector<8x128xf32>
    %c0_14 = arith.constant 0 : index
    %c0_15 = arith.constant 0 : index
    %47 = vector.load %arg6[%c0_14, %c0_15] : memref<8x128xf32, #tpu.memory_space<vmem>>, vector<8x128xf32>
    %48 = arith.addf %47, %46 : vector<8x128xf32>
    %c0_16 = arith.constant 0 : index
    %c0_17 = arith.constant 0 : index
    %49 = vector.load %arg6[%c0_16, %c0_17] : memref<8x128xf32, #tpu.memory_space<vmem>>, vector<8x128xf32>
    tpu.vector_store %arg6[%c0_16, %c0_17], %48 {strides = array<i32>} : memref<8x128xf32, #tpu.memory_space<vmem>>, vector<8x128xf32>,
    return
  }
  func.func @transform_0(%arg0: i32, %arg1: i32) -> (i32, i32) {
    %c0_i32 = arith.constant 0 : i32
    %c0_i32_0 = arith.constant 0 : i32
    return %arg0, %c0_i32 : i32, i32
  }
  func.func @transform_1(%arg0: i32, %arg1: i32) -> (i32, i32) {
    %c0_i32 = arith.constant 0 : i32
    %c0_i32_0 = arith.constant 0 : i32
    return %c0_i32, %arg1 : i32, i32
  }
  func.func @transform_2(%arg0: i32, %arg1: i32) -> (i32, i32) {
    %c0_i32 = arith.constant 0 : i32
    %c0_i32_0 = arith.constant 0 : i32
    return %arg0, %c0_i32 : i32, i32
  }
  func.func @transform_3(%arg0: i32, %arg1: i32) -> (i32, i32) {
    %c0_i32 = arith.constant 0 : i32
    %c0_i32_0 = arith.constant 0 : i32
    return %c0_i32, %arg1 : i32, i32
  }
  func.func @transform_4(%arg0: i32, %arg1: i32) -> (i32, i32) {
    %c0_i32 = arith.constant 0 : i32
    %c0_i32_0 = arith.constant 0 : i32
    return %arg0, %c0_i32 : i32, i32
  }
}

</mosaic_0001>

<bundles_post_ra>
// kernel: tpu_custom_call.1
= control target key start
LH: loop header
LB: loop body
LE: loop exit
PB: predicated region body
PF: predicated region fallthrough
CT: control target
= control target key end

     0   :  { %9 = vsyncpa [#allocation3], 0  ;;  %s835_s0 = inlined_call_operand.vmem [shape: f32[128,128], index: 0, kind: input, shape index: {}]   ;;  %s836_s1 = inlined_call_operand.hbm [shape: f32[128,128], index: 1, kind: input, shape index: {}]   ;;  %s837_s2 = inlined_call_operand.vmem [shape: s32[128,1], index: 2, kind: input, shape index: {}]   ;;  %s838_s3 = inlined_call_operand.vmem [shape: s32[1,128], index: 3, kind: input, shape index: {}]   ;;  %s839_s4 = inlined_call_operand.hbm [shape: f32[8,128], index: 4, kind: output, shape index: {}]  }
   0x1   :  { %10 = vsyncpa [#allocation4], 0  ;;  %s727_s15 = smov [#allocation2]   ;;  %s679_s19 = scalar_lea.hbm %s836_s1, 2048 }
   0x2   :  { %s18_s16 = sshll.u32 %s727_s15, 4  ;;  %p680_p0 = scmp.ne.s32.totalorder %s836_s1, %s679_s19  ;;  %s19_s16 = int_to_ptr.vmem [resolvable:$true] %s18_s16 }
   0x3   :  { %p683_p1 = scmp.lt.u32.totalorder %s679_s19, %s836_s1 }
   0x5   :  { %p685_p2 = pnand %p683_p1, %p680_p0 }
   0x7   :  { %688 = shalt.err (!%p685_p2)
}
   0x8   :  { %s689_s24 = scalar_lea.vmem %s19_s16, 2048  ;;  %p694_p4 = scmp.lt.s32.totalorder %s19_s16, %s19_s16 }
   0x9   :  { %p690_p3 = scmp.ne.s32.totalorder %s19_s16, %s689_s24  ;;  %p695_p5 = scmp.lt.s32.totalorder %s689_s24, %s689_s24 }
   0xb   :  { %p696_p6 = por %p695_p5, %p694_p4 }
   0xd   :  { %p697_p7 = pnand %p696_p6, %p690_p3 }
   0xf   :  { %700 = shalt.err (!%p697_p7)
}
  0x10   :  { %s728_s25 = smov 128   ;;  %s729_s26 = smov 8  }
  0x11   :  { %24 = dma.hbm_to_vmem [thread:$0]  %s836_s1, 2048, %s19_s16, [#allocation3], %s728_s25, %s728_s25, %s729_s26  }
  0x12   :  { %723 = dma.done.wait [#allocation3], 2048  }
  0x13   :  { %724 = vsyncadd [#allocation3], 4294965248  ;;  %v730_v0 = vmov 0   ;;  %v53_v1 = vld [vmem:[#allocation2] sm:$0xff]  ;;  %v54_v2 = vld [vmem:[#allocation2 + $0x8] sm:$0xff]  ;;  %v399_v42 = vlaneseq }
  0x14   :  { %678 = vset.pattern.permute.xlu0 %v730_v0  ;;  %v55_v3 = vld [vmem:[#allocation2 + $0x10] sm:$0xff]  ;;  %v624_v4 = vpack.c.bf16 %v54_v2, %v53_v1  ;;  %v56_v5 = vld [vmem:[#allocation2 + $0x18] sm:$0xff]  ;;  %v57_v7 = vld [vmem:[#allocation2 + $0x20] sm:$0xff] }
  0x15   :  { %v628_v6 = vpack.c.bf16 %v56_v5, %v55_v3  ;;  %v58_v8 = vld [vmem:[#allocation2 + $0x28] sm:$0xff]  ;;  %v37_v10 = vld [vmem:[%s835_s0] sm:$0xff]  ;;  %v59_v12 = vld [vmem:[#allocation2 + $0x30] sm:$0xff]  ;;  %v400_v47 = vand.u32 127, %v399_v42 }
  0x16   :  { %625 = vmatprep.subr.bf16.mxu0 %v624_v4  ;;  %656 = vmatprep.subr.bf16.mxu1 %v624_v4  ;;  %v632_v9 = vpack.c.bf16 %v58_v8, %v57_v7  ;;  %v45_v11 = vld [vmem:[%s835_s0 + $0x40] sm:$0xff]  ;;  %v60_v13 = vld [vmem:[#allocation2 + $0x38] sm:$0xff]  ;;  %v62_v16 = vld [vmem:[#allocation2 + $0x48] sm:$0xff] }
  0x17   :  { %627 = vmatpush3.bf16.msra.mxu0 %v624_v4  ;;  %664 = vmatpush3.bf16.msra.mxu1 %v624_v4  ;;  %v636_v14 = vpack.c.bf16 %v60_v13, %v59_v12  ;;  %v61_v15 = vld [vmem:[#allocation2 + $0x40] sm:$0xff]  ;;  %v63_v19 = vld [vmem:[#allocation2 + $0x50] sm:$0xff]  ;;  %v64_v20 = vld [vmem:[#allocation2 + $0x58] sm:$0xff]  ;;  %vm419_vm1 = vcmp.lt.s32.totalorder %v400_v47, 8 }
  0x18   :  { %629 = vmatprep.subr.bf16.mxu0 %v628_v6  ;;  %657 = vmatprep.subr.bf16.mxu1 %v628_v6  ;;  %v214_v17 = vld [vmem:[%s837_s2] sm:$0xff]  ;;  %v640_v18 = vpack.c.bf16 %v62_v16, %v61_v15  ;;  %v644_v21 = vpack.c.bf16 %v64_v20, %v63_v19  ;;  %v66_v23 = vld [vmem:[#allocation2 + $0x68] sm:$0xff]  ;;  %v67_v25 = vld [vmem:[#allocation2 + $0x70] sm:$0xff] }
  0x19   :  { %600 = vmatprep.mubr.f32.mxu0 %v37_v10  ;;  %612 = vmatprep.mubr.f32.mxu1 %v45_v11  ;;  %v65_v22 = vld [vmem:[#allocation2 + $0x60] sm:$0xff]  ;;  %v68_v26 = vld [vmem:[#allocation2 + $0x78] sm:$0xff]  ;;  %v38_v28 = vld [vmem:[%s835_s0 + $0x8] sm:$0xff] }
  0x1a   :  { %232 = vperm.xlu0 %678, %v214_v17   ;;  %v648_v24 = vpack.c.bf16 %v66_v23, %v65_v22  ;;  %v652_v27 = vpack.c.bf16 %v68_v26, %v67_v25  ;;  %v46_v29 = vld [vmem:[%s835_s0 + $0x48] sm:$0xff]  ;;  %v39_v30 = vld [vmem:[%s835_s0 + $0x10] sm:$0xff]  ;;  %v40_v32 = vld [vmem:[%s835_s0 + $0x18] sm:$0xff] }
  0x1b   :  { %631 = vmatpush3.bf16.msra.mxu0 %v628_v6  ;;  %665 = vmatpush3.bf16.msra.mxu1 %v628_v6  ;;  %v47_v31 = vld [vmem:[%s835_s0 + $0x50] sm:$0xff]  ;;  %v48_v33 = vld [vmem:[%s835_s0 + $0x58] sm:$0xff]  ;;  %v41_v34 = vld [vmem:[%s835_s0 + $0x20] sm:$0xff] }
  0x1c   :  { %633 = vmatprep.subr.bf16.mxu0 %v632_v9  ;;  %658 = vmatprep.subr.bf16.mxu1 %v632_v9  ;;  %v49_v35 = vld [vmem:[%s835_s0 + $0x60] sm:$0xff]  ;;  %v42_v36 = vld [vmem:[%s835_s0 + $0x28] sm:$0xff]  ;;  %v43_v38 = vld [vmem:[%s835_s0 + $0x30] sm:$0xff] }
  0x1d   :  { %v50_v37 = vld [vmem:[%s835_s0 + $0x68] sm:$0xff]  ;;  %v51_v39 = vld [vmem:[%s835_s0 + $0x70] sm:$0xff]  ;;  %v44_v40 = vld [vmem:[%s835_s0 + $0x38] sm:$0xff] }
  0x1e   :  { %v52_v41 = vld [vmem:[%s835_s0 + $0x78] sm:$0xff]  ;;  %v519_v43 = vld [vmem:[%s838_s3] ss:$0 sm:$0xff]  ;;  %s731_s0 = smov [#allocation5]  }
  0x1f   :  { %635 = vmatpush3.bf16.msra.mxu0 %v632_v9  ;;  %666 = vmatpush3.bf16.msra.mxu1 %v632_v9  ;;  %s510_s9 = sshll.u32 %s731_s0, 4  ;;  %s511_s9 = int_to_ptr.vmem [resolvable:$true] %s510_s9 }
  0x20   :  { %637 = vmatprep.subr.bf16.mxu0 %v636_v14  ;;  %659 = vmatprep.subr.bf16.mxu1 %v636_v14  ;;  %s701_s3 = scalar_lea.vmem %s511_s9, 128  ;;  %p706_p9 = scmp.lt.s32.totalorder %s511_s9, %s511_s9 }
  0x21   :  { %p702_p8 = scmp.ne.s32.totalorder %s511_s9, %s701_s3  ;;  %p707_p10 = scmp.lt.s32.totalorder %s701_s3, %s701_s3 }
  0x23   :  { %639 = vmatpush3.bf16.msra.mxu0 %v636_v14  ;;  %667 = vmatpush3.bf16.msra.mxu1 %v636_v14  ;;  %p708_p11 = por %p707_p10, %p706_p9 }
  0x24   :  { %641 = vmatprep.subr.bf16.mxu0 %v640_v18  ;;  %660 = vmatprep.subr.bf16.mxu1 %v640_v18 }
  0x25   :  { %p709_p12 = pnand %p708_p11, %p702_p8 }
  0x27   :  { %643 = vmatpush3.bf16.msra.mxu0 %v640_v18  ;;  %668 = vmatpush3.bf16.msra.mxu1 %v640_v18 }
  0x28   :  { %645 = vmatprep.subr.bf16.mxu0 %v644_v21  ;;  %661 = vmatprep.subr.bf16.mxu1 %v644_v21 }
  0x2b   :  { %647 = vmatpush3.bf16.msra.mxu0 %v644_v21  ;;  %669 = vmatpush3.bf16.msra.mxu1 %v644_v21 }
  0x2c   :  { %649 = vmatprep.subr.bf16.mxu0 %v648_v24  ;;  %662 = vmatprep.subr.bf16.mxu1 %v648_v24 }
  0x2f   :  { %651 = vmatpush3.bf16.msra.mxu0 %v648_v24  ;;  %670 = vmatpush3.bf16.msra.mxu1 %v648_v24 }
  0x30   :  { %653 = vmatprep.subr.bf16.mxu0 %v652_v27  ;;  %663 = vmatprep.subr.bf16.mxu1 %v652_v27 }
  0x33   :  { %655 = vmatpush3.bf16.msra.mxu0 %v652_v27  ;;  %671 = vmatpush3.bf16.msra.mxu1 %v652_v27 }
  0x36   :  { %601 = vmatmul.mubr.f32.vlgmr.msra.gmra.mrb[0].mxu0 %v38_v28  ;;  %613 = vmatmul.mubr.f32.vlgmr.msra.gmra.mrb[0].mxu1 %v46_v29 }
  0x37   :  { %603 = vmatprep.mubr.f32.mxu0 %v39_v30  ;;  %615 = vmatprep.mubr.f32.mxu1 %v47_v31 }
  0x3a   :  { %604 = vmatmul.mubr.f32.gmra.mrb[2].mxu0 %v40_v32  ;;  %616 = vmatmul.mubr.f32.gmra.mrb[2].mxu1 %v48_v33 }
  0x3b   :  { %606 = vmatprep.mubr.f32.mxu0 %v41_v34  ;;  %618 = vmatprep.mubr.f32.mxu1 %v49_v35 }
  0x3e   :  { %607 = vmatmul.mubr.f32.gmra.mrb[4].mxu0 %v42_v36  ;;  %619 = vmatmul.mubr.f32.gmra.mrb[4].mxu1 %v50_v37 }
  0x3f   :  { %609 = vmatprep.mubr.f32.mxu0 %v43_v38  ;;  %621 = vmatprep.mubr.f32.mxu1 %v51_v39 }
  0x42   :  { %610 = vmatmul.mubr.f32.gmra.mrb[6].mxu0 %v44_v40  ;;  %622 = vmatmul.mubr.f32.gmra.mrb[6].mxu1 %v52_v41 }
  0x99   :  { %v233_v44 = vpop.permute.xlu0 %232 }
  0x9a   :  { %vm283_vm0 = vcmp.eq.s32.totalorder %v233_v44, %v519_v43 }
 0x109   :  { %v602_v45 = vpop.f32.mrb[0].mxu0  ;;  %v614_v46 = vpop.f32.mrb[0].mxu1 }
 0x10a   :  { %v135_v48 = vpop.f32.mrb[1].mxu0  ;;  %v175_v49 = vpop.f32.mrb[1].mxu1 }
 0x10b   :  { %v299_v50 = vsub.f32 1.0, %v135_v48  ;;  %v520_v51 = vadd.f32 -0.4, %v135_v48 }
 0x10d   :  { %v331_v52 = vsel %vm283_vm0, %v299_v50, %v520_v51  ;;  %v605_v53 = vpop.f32.mrb[2].mxu0  ;;  %v617_v54 = vpop.f32.mrb[2].mxu1 }
 0x10e   :  { %v347_v55 = vmax.f32 %v331_v52, 0.0  ;;  %v145_v56 = vpop.f32.mrb[3].mxu0  ;;  %v185_v57 = vpop.f32.mrb[3].mxu1 }
 0x110   :  { %v470_v58 = vsel %vm419_vm1, %v347_v55, 0.0 }
 0x111   :  { %v608_v59 = vpop.f32.mrb[4].mxu0  ;;  %v620_v60 = vpop.f32.mrb[4].mxu1  ;;  %503 = vst [vmem:[#allocation5] sm:$0xff] %v470_v58 }
 0x112   :  { %v155_v61 = vpop.f32.mrb[5].mxu0  ;;  %v195_v62 = vpop.f32.mrb[5].mxu1 }
 0x113   :  { %712 = shalt.err (!%p709_p12)
}
 0x114   :  { %s713_s12 = scalar_lea.hbm %s839_s4, 128 }
 0x115   :  { %p714_p13 = scmp.ne.s32.totalorder %s839_s4, %s713_s12  ;;  %p717_p0 = scmp.lt.u32.totalorder %s713_s12, %s839_s4 }
 0x117   :  { %p719_p1 = pnand %p717_p0, %p714_p13 }
 0x119   :  { %722 = shalt.err (!%p719_p1)
}
 0x11a   :  { %513 = dma.vmem_to_hbm [thread:$0]  %s511_s9, 128, %s839_s4, [#allocation4]   ;;  %v611_v63 = vpop.f32.mrb[6].mxu0  ;;  %v623_v0 = vpop.f32.mrb[6].mxu1 }
 0x11b   :  { %v165_v1 = vpop.f32.mrb[7].mxu0  ;;  %v205_v2 = vpop.f32.mrb[7].mxu1 }
 0x11c   :  { %725 = dma.done.wait [#allocation4], 128  }
 0x11d   :  { %726 = vsyncadd [#allocation4], 4294967168 }
 0x11e   :  { %517 = vsyncpa [#allocation3], 1 }
 0x11f   :  { %518 = vsyncpa [#allocation4], 1 }

</bundles_post_ra>
